<compile_context>
chip_gen: v5e
topology: v5e:2x2
jax: 0.10.0
libtpu: 0.0.40
codegen_flags: <defaults>
</compile_context>

<pallas_src>
import jax
import jax.numpy as jnp
from jax.experimental import pallas as pl
from jax.experimental.pallas import tpu as pltpu


def _device_kind():
    try:
        return jax.devices()[0].device_kind.lower()
    except Exception:
        return ""


_KIND = _device_kind()
_IS_V7X = any(tag in _KIND for tag in ("v7", "tpu7", "7x"))

if _IS_V7X:                            # 64 MiB physical VMEM per TensorCore
    _TILE_BUDGET_BYTES = 4 * 1024 * 1024
    _VMEM_LIMIT_BYTES = 48 * 1024 * 1024
else:                                  # v5e / v6e: 128 MiB physical VMEM
    _TILE_BUDGET_BYTES = 8 * 1024 * 1024
    _VMEM_LIMIT_BYTES = 64 * 1024 * 1024


def _pick_tile_rows(n_rows, v, itemsize):
    """Rows per grid step: budget by bytes (logits row + lane-padded packed
    labels/mask row), multiple of 8, capped by the rounded-up row count."""
    per_row = v * itemsize + 512       # 512 B = (tile, 2) f32 lane-padded to 128 lanes
    rows = _TILE_BUDGET_BYTES // max(1, per_row)
    rows = max(8, (int(rows) // 8) * 8)
    cap = max(8, ((n_rows + 7) // 8) * 8)
    return min(rows, cap)


def _prior_offset_kernel(logits_ref, side_ref, cls_ref, logp_ref,
                         out_ref, acc_ref):
    t = pl.program_id(1)

    @pl.when(t == 0)
    def _():
        acc_ref[0] = jnp.float32(0.0)
        acc_ref[1] = jnp.float32(0.0)

    # (R, V) adjusted logits; f32 cast happens in-kernel (inputs may be bf16).
    x = logits_ref[...].astype(jnp.float32) + logp_ref[...]

    # Stable log-sum-exp per row.
    m = jnp.max(x, axis=-1, keepdims=True)                            # (R, 1)
    lse = m + jnp.log(jnp.sum(jnp.exp(x - m), axis=-1, keepdims=True))

    lab = side_ref[:, 0:1]                                            # (R, 1) label as f32
    msk = side_ref[:, 1:2]                                            # (R, 1) mask (f32)

    # Label logit via a fused select against the resident class-index row
    # (no per-step (R, V) iota materialization).
    label_logit = jnp.sum(jnp.where(cls_ref[...] == lab, x, 0.0),
                          axis=-1, keepdims=True)                     # (R, 1)

    nll = lse - label_logit                                           # (R, 1)

    # where-guard: garbage rows of a partial trailing logits block have
    # mask == 0 and must not poison the sum (Inf/NaN * 0 = NaN).
    contrib = jnp.where(msk != 0.0, nll * msk, 0.0)

    # Scalar accumulation in SMEM (no lane-padded accumulator traffic).
    acc_ref[0] += jnp.sum(contrib)
    acc_ref[1] += jnp.sum(msk)

    @pl.when(t == pl.num_programs(1) - 1)
    def _():
        # sublane 0 = partial numerator, sublane 1 = partial denominator.
        sub = jax.lax.broadcasted_iota(jnp.int32, out_ref.shape, 1)
        out_ref[...] = jnp.where(sub == 0, acc_ref[0],
                                 jnp.where(sub == 1, acc_ref[1], 0.0))


@jax.jit
def prior_offset_loss(logits, labels, mask, priors):
    V = logits.shape[-1]
    N = 1
    for d in logits.shape[:-1]:
        N *= d

    # Logits stream in their native dtype (no extra HBM round trip).
    x = logits.reshape(N, V)
    # Pack labels + mask into one (N, 2) f32 side stream (one lane-padded
    # buffer / DMA stream instead of two). Labels < 2^24 are exact in f32.
    side = jnp.concatenate(
        [labels.reshape(N, 1).astype(jnp.float32),
         mask.reshape(N, 1).astype(jnp.float32)], axis=1)
    logp = jnp.log(priors.astype(jnp.float32) + 1e-12).reshape(1, V)
    cls = jnp.arange(V, dtype=jnp.float32).reshape(1, V)

    tile = _pick_tile_rows(N, V, x.dtype.itemsize)
    n_tiles = pl.cdiv(N, tile)
    # Row partitions: only worthwhile on dual-TensorCore v7x (leading axis is
    # sharded across cores); single-TC chips (v5e/v6e) use P = 1.
    P = 2 if (_IS_V7X and n_tiles >= 2) else 1
    T = pl.cdiv(n_tiles, P)

    # Pad only the tiny side stream so every grid step reads valid (zero)
    # labels/mask; padded rows contribute nothing.
    padded_rows = P * T * tile
    if padded_rows > N:
        side = jnp.pad(side, ((0, padded_rows - N), (0, 0)))

    # Clamp redundant tail steps of the last partition onto the last valid
    # logits tile (their mask is zero, so they add nothing).
    def logits_map(p, t):
        return (jnp.minimum(p * T + t, n_tiles - 1), 0)

    def side_map(p, t):
        return (p * T + t, 0)

    if P == 2:
        dims = (pltpu.CORE_PARALLEL, pltpu.ARBITRARY)   # real 2-TC sharding on v7x
    else:
        dims = (pltpu.ARBITRARY, pltpu.ARBITRARY)

    out = pl.pallas_call(
        _prior_offset_kernel,
        out_shape=jax.ShapeDtypeStruct((P, 8, 128), jnp.float32),
        grid_spec=pltpu.PrefetchScalarGridSpec(
            num_scalar_prefetch=0,
            grid=(P, T),
            in_specs=[
                pl.BlockSpec((tile, V), logits_map),          # logits tile (native dtype)
                pl.BlockSpec((tile, 2), side_map),            # packed labels + mask
                pl.BlockSpec((1, V), lambda p, t: (0, 0)),    # class indices (resident)
                pl.BlockSpec((1, V), lambda p, t: (0, 0)),    # log priors (resident)
            ],
            out_specs=pl.BlockSpec((1, 8, 128), lambda p, t: (p, 0, 0)),
            scratch_shapes=[
                pltpu.SMEM((2,), jnp.float32),   # scalar (num, den) accumulators
            ],
        ),
        compiler_params=pltpu.CompilerParams(
            dimension_semantics=dims,
            vmem_limit_bytes=_VMEM_LIMIT_BYTES,
        ),
        cost_estimate=pl.CostEstimate(
            flops=5 * N * V,
            transcendentals=N * V,
            bytes_accessed=N * V * x.dtype.itemsize + 8 * N + 8 * V,
        ),
    )(x, side, cls, logp)

    # Cross-partition reduce + divide in the wrapper (keeps the kernel output
    # race-free when the P axis is sharded across TensorCores).
    num = jnp.sum(out[:, 0, 0])
    den = jnp.sum(out[:, 1, 0])
    return num / den


class PriorOffsetCriterion:
    """JAX/Pallas analogue of the PyTorch PriorOffsetCriterion module."""

    def __init__(self, priors):
        self.priors = jnp.asarray(priors, jnp.float32)

    def __call__(self, logits, labels, mask, *args):
        return prior_offset_loss(logits, labels, mask, self.priors)


def _reference(logits, labels, mask, priors):
    x = logits.astype(jnp.float32) + jnp.log(priors.astype(jnp.float32) + 1e-12)
    logp = jax.nn.log_softmax(x, axis=-1)
    nll = -jnp.take_along_axis(logp, labels[..., None].astype(jnp.int32),
                               axis=-1)[..., 0]
    m = mask.astype(jnp.float32)
    return jnp.sum(nll * m) / jnp.sum(m)


if __name__ == "__main__":
    key = jax.random.PRNGKey(0)
    k1, k2, k3, k4, k5 = jax.random.split(key, 5)

    # Case 1: N = B*T = 26 rows (not a multiple of the tile -> exercises the
    # partial trailing logits block and the masked tail), f32 logits.
    B, T, V = 2, 13, 128
    logits = jax.random.normal(k1, (B, T, V), dtype=jnp.float32)
    labels = jax.random.randint(k2, (B, T), 0, V, dtype=jnp.int32)
    mask = (jax.random.uniform(k3, (B, T)) > 0.3).astype(jnp.float32)
    # deterministic synthetic class priors (positive, sum to 1)
    priors = jax.nn.softmax(jax.random.normal(k4, (V,), dtype=jnp.float32))

    criterion = PriorOffsetCriterion(priors)
    loss = jax.block_until_ready(criterion(logits, labels, mask))
    ref = jax.block_until_ready(_reference(logits, labels, mask, priors))
    assert jnp.allclose(loss, ref, rtol=1e-5, atol=1e-5), (loss, ref)

    # Case 2: tiny N (< 8 rows), bf16 logits, non-binary mask weights.
    logits2 = jax.random.normal(k5, (1, 5, V), dtype=jnp.bfloat16)
    labels2 = labels[:1, :5]
    mask2 = jnp.array([[1.0, 0.0, 0.5, 2.0, 1.0]], dtype=jnp.float32)
    loss2 = jax.block_until_ready(criterion(logits2, labels2, mask2))
    ref2 = jax.block_until_ready(_reference(logits2, labels2, mask2, priors))
    assert jnp.allclose(loss2, ref2, rtol=1e-4, atol=1e-4), (loss2, ref2)

    print("KERNEL_OK")
</pallas_src>

<mosaic_0001>
module attributes {stable_mosaic.version = 11 : i64} {
  func.func @_prior_offset_kernel(%arg0: i32, %arg1: i32, %arg2: memref<32x128xf32, #tpu.memory_space<vmem>>, %arg3: memref<32x2xf32, #tpu.memory_space<vmem>>, %arg4: memref<1x128xf32, #tpu.memory_space<vmem>>, %arg5: memref<1x128xf32, #tpu.memory_space<vmem>>, %arg6: memref<1x8x128xf32, #tpu.memory_space<vmem>>, %arg7: memref<2xf32, #tpu.memory_space<smem>>) attributes {dimension_semantics = [#tpu.dimension_semantics<arbitrary>, #tpu.dimension_semantics<arbitrary>], iteration_bounds = array<i64: 1, 1>, scalar_prefetch = 0 : i64, scratch_operands = 1 : i64, tpu.core_type = #tpu.core_type<tc>, window_params = [{transform_indices = @transform_0, window_bounds = array<i64: 32, 128>}, {transform_indices = @transform_1, window_bounds = array<i64: 32, 2>}, {pipeline_mode = #tpu.pipeline_mode<synchronous>, transform_indices = @transform_2, window_bounds = array<i64: 1, 128>}, {pipeline_mode = #tpu.pipeline_mode<synchronous>, transform_indices = @transform_3, window_bounds = array<i64: 1, 128>}, {transform_indices = @transform_4, window_bounds = array<i64: 1, 8, 128>}]} {
    %c0_i32 = arith.constant 0 : i32
    %0 = arith.cmpi eq, %arg1, %c0_i32 : i32
    %1 = arith.extui %0 : i1 to i32
    %c0_i32_0 = arith.constant 0 : i32
    %2 = arith.cmpi ne, %1, %c0_i32_0 : i32
    scf.if %2 {
      %cst_22 = arith.constant 0.000000e+00 : f32
      %c0_23 = arith.constant 0 : index
      %49 = memref.load %arg7[%c0_23] : memref<2xf32, #tpu.memory_space<smem>>
      memref.store %cst_22, %arg7[%c0_23] : memref<2xf32, #tpu.memory_space<smem>>
      %cst_24 = arith.constant 0.000000e+00 : f32
      %c1_25 = arith.constant 1 : index
      %50 = memref.load %arg7[%c1_25] : memref<2xf32, #tpu.memory_space<smem>>
      memref.store %cst_24, %arg7[%c1_25] : memref<2xf32, #tpu.memory_space<smem>>
    } else {
    }
    %c0 = arith.constant 0 : index
    %c0_1 = arith.constant 0 : index
    %3 = vector.load %arg2[%c0, %c0_1] : memref<32x128xf32, #tpu.memory_space<vmem>>, vector<32x128xf32>
    %c0_2 = arith.constant 0 : index
    %c0_3 = arith.constant 0 : index
    %4 = vector.load %arg5[%c0_2, %c0_3] : memref<1x128xf32, #tpu.memory_space<vmem>>, vector<1x128xf32>
    %5 = vector.broadcast %4 : vector<1x128xf32> to vector<32x128xf32>
    %6 = arith.addf %3, %5 : vector<32x128xf32>
    %cst = arith.constant dense<0xFF800000> : vector<32xf32>
    %7 = vector.multi_reduction <maximumf>, %6, %cst [1] : vector<32x128xf32> to vector<32xf32>
    %8 = vector.shape_cast %7 : vector<32xf32> to vector<32x1xf32>
    %9 = vector.broadcast %8 : vector<32x1xf32> to vector<32x128xf32>
    %10 = arith.subf %6, %9 : vector<32x128xf32>
    %11 = math.exp %10 : vector<32x128xf32>
    %cst_4 = arith.constant dense<0.000000e+00> : vector<32xf32>
    %12 = vector.multi_reduction <add>, %11, %cst_4 [1] : vector<32x128xf32> to vector<32xf32>
    %13 = vector.shape_cast %12 : vector<32xf32> to vector<32x1xf32>
    %14 = math.log %13 : vector<32x1xf32>
    %15 = arith.addf %8, %14 : vector<32x1xf32>
    %c0_5 = arith.constant 0 : index
    %c0_6 = arith.constant 0 : index
    %16 = vector.load %arg3[%c0_5, %c0_6] : memref<32x2xf32, #tpu.memory_space<vmem>>, vector<32x1xf32>
    %c0_7 = arith.constant 0 : index
    %c1 = arith.constant 1 : index
    %17 = vector.load %arg3[%c0_7, %c1] : memref<32x2xf32, #tpu.memory_space<vmem>>, vector<32x1xf32>
    %c0_8 = arith.constant 0 : index
    %c0_9 = arith.constant 0 : index
    %18 = vector.load %arg4[%c0_8, %c0_9] : memref<1x128xf32, #tpu.memory_space<vmem>>, vector<1x128xf32>
    %19 = vector.broadcast %18 : vector<1x128xf32> to vector<32x128xf32>
    %20 = vector.broadcast %16 : vector<32x1xf32> to vector<32x128xf32>
    %21 = arith.cmpf oeq, %19, %20 : vector<32x128xf32>
    %cst_10 = arith.constant 0.000000e+00 : f32
    %22 = vector.broadcast %cst_10 : f32 to vector<32x128xf32>
    %23 = arith.select %21, %6, %22 : vector<32x128xi1>, vector<32x128xf32>
    %cst_11 = arith.constant dense<0.000000e+00> : vector<32xf32>
    %24 = vector.multi_reduction <add>, %23, %cst_11 [1] : vector<32x128xf32> to vector<32xf32>
    %25 = vector.shape_cast %24 : vector<32xf32> to vector<32x1xf32>
    %26 = arith.subf %15, %25 : vector<32x1xf32>
    %cst_12 = arith.constant 0.000000e+00 : f32
    %27 = vector.broadcast %cst_12 : f32 to vector<32x1xf32>
    %28 = arith.cmpf one, %17, %27 : vector<32x1xf32>
    %29 = arith.mulf %26, %17 : vector<32x1xf32>
    %cst_13 = arith.constant 0.000000e+00 : f32
    %30 = vector.broadcast %cst_13 : f32 to vector<32x1xf32>
    %31 = arith.select %28, %29, %30 : vector<32x1xi1>, vector<32x1xf32>
    %c0_14 = arith.constant 0 : index
    %32 = memref.load %arg7[%c0_14] : memref<2xf32, #tpu.memory_space<smem>>
    %33 = vector.shape_cast %31 : vector<32x1xf32> to vector<1x32x1xf32>
    %cst_15 = arith.constant dense<0.000000e+00> : vector<1xf32>
    %34 = vector.multi_reduction <add>, %33, %cst_15 [1, 2] : vector<1x32x1xf32> to vector<1xf32>
    %35 = vector.shape_cast %34 : vector<1xf32> to vector<1x1x1xf32>
    %36 = vector.extract %35[0, 0, 0] : f32 from vector<1x1x1xf32>
    %37 = arith.addf %32, %36 : f32
    %c0_16 = arith.constant 0 : index
    %38 = memref.load %arg7[%c0_16] : memref<2xf32, #tpu.memory_space<smem>>
    memref.store %37, %arg7[%c0_16] : memref<2xf32, #tpu.memory_space<smem>>
    %c1_17 = arith.constant 1 : index
    %39 = memref.load %arg7[%c1_17] : memref<2xf32, #tpu.memory_space<smem>>
    %40 = vector.shape_cast %17 : vector<32x1xf32> to vector<1x32x1xf32>
    %cst_18 = arith.constant dense<0.000000e+00> : vector<1xf32>
    %41 = vector.multi_reduction <add>, %40, %cst_18 [1, 2] : vector<1x32x1xf32> to vector<1xf32>
    %42 = vector.shape_cast %41 : vector<1xf32> to vector<1x1x1xf32>
    %43 = vector.extract %42[0, 0, 0] : f32 from vector<1x1x1xf32>
    %44 = arith.addf %39, %43 : f32
    %c1_19 = arith.constant 1 : index
    %45 = memref.load %arg7[%c1_19] : memref<2xf32, #tpu.memory_space<smem>>
    memref.store %44, %arg7[%c1_19] : memref<2xf32, #tpu.memory_space<smem>>
    %c0_i32_20 = arith.constant 0 : i32
    %46 = arith.cmpi eq, %arg1, %c0_i32_20 : i32
    %47 = arith.extui %46 : i1 to i32
    %c0_i32_21 = arith.constant 0 : i32
    %48 = arith.cmpi ne, %47, %c0_i32_21 : i32
    scf.if %48 {
      %49 = tpu.iota {dimensions = array<i32: 1>} : vector<1x8x128xi32>
      %c0_i32_22 = arith.constant 0 : i32
      %50 = vector.broadcast %c0_i32_22 : i32 to vector<1x8x128xi32>
      %51 = arith.cmpi eq, %49, %50 : vector<1x8x128xi32>
      %c0_23 = arith.constant 0 : index
      %52 = memref.load %arg7[%c0_23] : memref<2xf32, #tpu.memory_space<smem>>
      %c1_i32 = arith.constant 1 : i32
      %53 = vector.broadcast %c1_i32 : i32 to vector<1x8x128xi32>
      %54 = arith.cmpi eq, %49, %53 : vector<1x8x128xi32>
      %c1_24 = arith.constant 1 : index
      %55 = memref.load %arg7[%c1_24] : memref<2xf32, #tpu.memory_space<smem>>
      %cst_25 = arith.constant 0.000000e+00 : f32
      %56 = vector.broadcast %55 : f32 to vector<1x8x128xf32>
      %57 = vector.broadcast %cst_25 : f32 to vector<1x8x128xf32>
      %58 = arith.select %54, %56, %57 : vector<1x8x128xi1>, vector<1x8x128xf32>
      %59 = vector.broadcast %52 : f32 to vector<1x8x128xf32>
      %60 = arith.select %51, %59, %58 : vector<1x8x128xi1>, vector<1x8x128xf32>
      %c0_26 = arith.constant 0 : index
      %c0_27 = arith.constant 0 : index
      %c0_28 = arith.constant 0 : index
      %61 = vector.load %arg6[%c0_26, %c0_27, %c0_28] : memref<1x8x128xf32, #tpu.memory_space<vmem>>, vector<1x8x128xf32>
      tpu.vector_store %arg6[%c0_26, %c0_27, %c0_28], %60 {strides = array<i32>} : memref<1x8x128xf32, #tpu.memory_space<vmem>>, vector<1x8x128xf32>,
    } else {
    }
    return
  }
  func.func @transform_0(%arg0: i32, %arg1: i32) -> (i32, i32) {
    %c1_i32 = arith.constant 1 : i32
    %0 = arith.muli %arg0, %c1_i32 : i32
    %1 = arith.addi %0, %arg1 : i32
    %c0_i32 = arith.constant 0 : i32
    %2 = arith.minsi %1, %c0_i32 : i32
    %c0_i32_0 = arith.constant 0 : i32
    %c0_i32_1 = arith.constant 0 : i32
    return %2, %c0_i32_0 : i32, i32
  }
  func.func @transform_1(%arg0: i32, %arg1: i32) -> (i32, i32) {
    %c1_i32 = arith.constant 1 : i32
    %0 = arith.muli %arg0, %c1_i32 : i32
    %1 = arith.addi %0, %arg1 : i32
    %c0_i32 = arith.constant 0 : i32
    %c0_i32_0 = arith.constant 0 : i32
    return %1, %c0_i32 : i32, i32
  }
  func.func @transform_2(%arg0: i32, %arg1: i32) -> (i32, i32) {
    %c0_i32 = arith.constant 0 : i32
    %c0_i32_0 = arith.constant 0 : i32
    %c0_i32_1 = arith.constant 0 : i32
    return %c0_i32, %c0_i32_0 : i32, i32
  }
  func.func @transform_3(%arg0: i32, %arg1: i32) -> (i32, i32) {
    %c0_i32 = arith.constant 0 : i32
    %c0_i32_0 = arith.constant 0 : i32
    %c0_i32_1 = arith.constant 0 : i32
    return %c0_i32, %c0_i32_0 : i32, i32
  }
  func.func @transform_4(%arg0: i32, %arg1: i32) -> (i32, i32, i32) {
    %c0_i32 = arith.constant 0 : i32
    %c0_i32_0 = arith.constant 0 : i32
    %c0_i32_1 = arith.constant 0 : i32
    return %arg0, %c0_i32, %c0_i32_0 : i32, i32, i32
  }
}

</mosaic_0001>

<bundles_post_ra>
// kernel: prior_offset_loss.1
= control target key start
LH: loop header
LB: loop body
LE: loop exit
PB: predicated region body
PF: predicated region fallthrough
CT: control target
= control target key end

     0   :  { %v319_v2 = vmov 0   ;;  %vm208_vm8 = vcmask 7168   ;;  %s423_s0 = inlined_call_operand.vmem [shape: f32[26,128], index: 0, kind: input, shape index: {}]   ;;  %s424_s3 = inlined_call_operand.vmem [shape: f32[1,128], index: 3, kind: input, shape index: {}]   ;;  %s425_s1 = inlined_call_operand.vmem [shape: f32[32,2], index: 1, kind: input, shape index: {}]   ;;  %s426_s2 = inlined_call_operand.vmem [shape: f32[1,128], index: 2, kind: input, shape index: {}]   ;;  %s427_s4 = inlined_call_operand.vmem [shape: f32[1,8,128], index: 4, kind: output, shape index: {}]  }
   0x1   :  { %v81_v0 = vld [vmem:[%s423_s0 + $0x10] sm:$0xff]  ;;  %v301_v1 = vld [vmem:[%s424_s3] ss:$0 sm:$0xff]  ;;  %299 = vset.pattern.permute.xlu0 %v319_v2  ;;  %298 = vset.pattern.permute.xlu2 %v319_v2  ;;  %v80_v7 = vld [vmem:[%s423_s0 + $0x8] sm:$0xff] }
   0x2   :  { %v79_v3 = vld [vmem:[%s423_s0] sm:$0xff]  ;;  %300 = vset.pattern.permute.xlu1 %v319_v2  ;;  %v89_v4 = vadd.f32 %v301_v1, %v81_v0  ;;  %v82_v8 = vld [vmem:[%s423_s0 + $0x18] sm:$0xff]  ;;  %v88_v9 = vadd.f32 %v301_v1, %v80_v7  ;;  %v370_v11 = vld [vmem:[%s425_s1 + $0x8] sm:$0xff] }
   0x3   :  { %v87_v5 = vadd.f32 %v301_v1, %v79_v3  ;;  %v358_v6 = vld [vmem:[%s425_s1] sm:$0xff]  ;;  %v90_v10 = vadd.f32 %v301_v1, %v82_v8  ;;  %v376_v12 = vld [vmem:[%s425_s1 + $0x10] sm:$0xff]  ;;  %v382_v13 = vld [vmem:[%s425_s1 + $0x18] sm:$0xff]  ;;  %s320_s1 = smov 127   ;;  %vm180_vm5 = vcmp.ne.f32.partialorder %v370_v11, 0.0 }
   0x4   :  { %141 = vperm.xlu2 %298, %v358_v6   ;;  %95 = vmax.xlane.f32.xlu1 %v89_v4  ;;  %v302_v24 = vld [vmem:[%s426_s2] ss:$0 sm:$0xff]  ;;  %vm179_vm4 = vcmp.ne.f32.partialorder %v358_v6, 0.0  ;;  %vm181_vm6 = vcmp.ne.f32.partialorder %v376_v12, 0.0  ;;  %vm182_vm7 = vcmp.ne.f32.partialorder %v382_v13, 0.0 }
   0x5   :  { %91 = vmax.xlane.f32.xlu0 %v87_v5 }
   0xc   :  { %146 = vperm.xlu2 %298, %v370_v11   ;;  %97 = vmax.xlane.f32.xlu1 %v90_v10 }
   0xd   :  { %93 = vmax.xlane.f32.xlu0 %v88_v9 }
  0x21   :  { %151 = vperm.xlu0 %299, %v376_v12  }
  0x25   :  { %156 = vperm.xlu1 %300, %v382_v13  }
  0x5e   :  { %v142_v26 = vpop.permute.xlu2 %141 }
  0x5f   :  { %vm159_vm0 = vcmp.eq.f32.partialorder %v302_v24, %v142_v26 }
  0x60   :  { %v163_v27 = vsel %vm159_vm0, %v87_v5, 0.0 }
  0x66   :  { %v147_v29 = vpop.permute.xlu2 %146 }
  0x67   :  { %vm160_vm1 = vcmp.eq.f32.partialorder %v302_v24, %v147_v29 }
  0x68   :  { %v164_v31 = vsel %vm160_vm1, %v88_v9, 0.0 }
  0x77   :  { %v385_v14 = vpop.xlane.xlu1 %95 }
  0x78   :  { %v92_v15 = vpop.xlane.xlu0 %91  ;;  %v101_v16 = vsub.f32 %v89_v4, %v385_v14 }
  0x79   :  { %v99_v17 = vsub.f32 %v87_v5, %v92_v15 }
  0x7a   :  { %v107_v18 = vmul.f32 1.442695, %v101_v16 }
  0x7b   :  { %v103_v19 = vmul.f32 1.442695, %v99_v17 }
  0x7c   :  { %303 = vpow2.f32 %v107_v18 }
  0x7d   :  { %305 = vpow2.f32 %v103_v19 }
  0x7f   :  { %v98_v30 = vpop.xlane.xlu1 %97 }
  0x80   :  { %v94_v20 = vpop.xlane.xlu0 %93  ;;  %v102_v32 = vsub.f32 %v90_v10, %v98_v30 }
  0x81   :  { %v100_v21 = vsub.f32 %v88_v9, %v94_v20 }
  0x82   :  { %v304_v22 = vpop.eup %303  ;;  %v109_v34 = vmul.f32 1.442695, %v102_v32 }
  0x83   :  { %v105_v23 = vmul.f32 1.442695, %v100_v21  ;;  %v306_v25 = vpop.eup %305  ;;  %115 = vadd.xlane.f32.xlu0 %v304_v22 }
  0x84   :  { %111 = vadd.xlane.f32.xlu2 %v306_v25 }
  0x85   :  { %307 = vpow2.f32 %v105_v23 }
  0x86   :  { %309 = vpow2.f32 %v109_v34 }
  0x8b   :  { %v308_v28 = vpop.eup %307 }
  0x8c   :  { %113 = vadd.xlane.f32.xlu1 %v308_v28  ;;  %167 = vadd.xlane.f32.xlu2 %v163_v27  ;;  %v310_v38 = vpop.eup %309 }
  0x93   :  { %v152_v33 = vpop.permute.xlu0 %151 }
  0x94   :  { %169 = vadd.xlane.f32.xlu2 %v164_v31  ;;  %vm161_vm2 = vcmp.eq.f32.partialorder %v302_v24, %v152_v33 }
  0x95   :  { %v165_v36 = vsel %vm161_vm2, %v89_v4, 0.0 }
  0x97   :  { %v157_v35 = vpop.permute.xlu1 %156  ;;  %229 = vrot.lane.b32.xlu0 %v358_v6, %s320_s1 }
  0x98   :  { %vm162_vm3 = vcmp.eq.f32.partialorder %v302_v24, %v157_v35 }
  0x99   :  { %v166_v37 = vsel %vm162_vm3, %v90_v10, 0.0 }
  0x9a   :  { %173 = vadd.xlane.f32.xlu1 %v166_v37 }
  0x9c   :  { %171 = vadd.xlane.f32.xlu2 %v165_v36 }
  0x9f   :  { %233 = vrot.lane.b32.xlu0 %v376_v12, %s320_s1 }
  0xa4   :  { %117 = vadd.xlane.f32.xlu2 %v310_v38 }
  0xbc   :  { %231 = vrot.lane.b32.xlu2 %v370_v11, %s320_s1 }
  0xf6   :  { %v116_v41 = vpop.xlane.xlu0 %115 }
  0xf7   :  { %v112_v39 = vpop.xlane.xlu2 %111 }
  0xf8   :  { %311 = vlog2.f32 %v112_v39 }
  0xfe   :  { %v312_v40 = vpop.eup %311 }
  0xff   :  { %v114_v42 = vpop.xlane.xlu1 %113  ;;  %v120_v43 = vmul.f32 0.6931472, %v312_v40  ;;  %v168_v44 = vpop.xlane.xlu2 %167 }
 0x100   :  { %313 = vlog2.f32 %v114_v42 }
 0x101   :  { %315 = vlog2.f32 %v116_v41  ;;  %v127_v45 = vadd.f32 %v120_v43, %v92_v15  ;;  %v263_v43 = vlaneseq }
 0x103   :  { %v175_v46 = vsub.f32 %v127_v45, %v168_v44  ;;  %v264_v44 = vshrl.u32 %v263_v43, 7 }
 0x105   :  { %v183_v48 = vmul.f32 %v175_v46, %v358_v6  ;;  %vm267_vm9 = vcmp.eq.s32.totalorder %v264_v44, 1  ;;  %vm265_vm10 = vcmp.eq.s32.totalorder %v264_v44, 0 }
 0x106   :  { %v314_v47 = vpop.eup %313 }
 0x107   :  { %v122_v49 = vmul.f32 0.6931472, %v314_v47  ;;  %v316_v50 = vpop.eup %315  ;;  %v170_v51 = vpop.xlane.xlu2 %169  ;;  %v187_v52 = vsel %vm179_vm4, %v183_v48, 0.0 }
 0x108   :  { %196 = vrot.lane.b32.xlu2 %v187_v52, %s320_s1  ;;  %v124_v54 = vmul.f32 0.6931472, %v316_v50 }
 0x109   :  { %v128_v53 = vadd.f32 %v122_v49, %v94_v20  ;;  %v230_v8 = vpop.permute.xlu0 %229 }
 0x10a   :  { %v129_v57 = vadd.f32 %v124_v54, %v385_v14  ;;  %v241_v18 = vsel %vm208_vm8, %v230_v8, 0.0 }
 0x10b   :  { %v176_v55 = vsub.f32 %v128_v53, %v170_v51 }
 0x10d   :  { %v184_v56 = vmul.f32 %v176_v55, %v370_v11  ;;  %v174_v2 = vpop.xlane.xlu1 %173 }
 0x10f   :  { %v188_v58 = vsel %vm180_vm5, %v184_v56, 0.0  ;;  %v172_v59 = vpop.xlane.xlu2 %171 }
 0x110   :  { %198 = vrot.lane.b32.xlu1 %v188_v58, %s320_s1  ;;  %v177_v60 = vsub.f32 %v129_v57, %v172_v59 }
 0x111   :  { %v234_v19 = vpop.permute.xlu0 %233 }
 0x112   :  { %v185_v61 = vmul.f32 %v177_v60, %v376_v12  ;;  %v244_v24 = vsel %vm208_vm8, %v234_v19, 0.0 }
 0x114   :  { %v189_v62 = vsel %vm181_vm6, %v185_v61, 0.0 }
 0x117   :  { %v118_v63 = vpop.xlane.xlu2 %117 }
 0x118   :  { %200 = vrot.lane.b32.xlu1 %v189_v62, %s320_s1  ;;  %317 = vlog2.f32 %v118_v63 }
 0x11e   :  { %v318_v0 = vpop.eup %317 }
 0x11f   :  { %v126_v1 = vmul.f32 0.6931472, %v318_v0  ;;  %v232_v7 = vpop.permute.xlu2 %231 }
 0x120   :  { %235 = vrot.lane.b32.xlu1 %v382_v13, %s320_s1  ;;  %v242_v17 = vsel %vm208_vm8, %v232_v7, 0.0 }
 0x121   :  { %v130_v3 = vadd.f32 %v126_v1, %v98_v30  ;;  %v243_v22 = vadd.f32 %v242_v17, %v241_v18 }
 0x123   :  { %v178_v4 = vsub.f32 %v130_v3, %v174_v2  ;;  %v245_v25 = vadd.f32 %v244_v24, %v243_v22 }
 0x125   :  { %v186_v5 = vmul.f32 %v178_v4, %v382_v13 }
 0x127   :  { %v190_v6 = vsel %vm182_vm7, %v186_v5, 0.0 }
 0x128   :  { %202 = vrot.lane.b32.xlu2 %v190_v6, %s320_s1 }
 0x162   :  { %v197_v9 = vpop.permute.xlu2 %196 }
 0x163   :  { %v209_v12 = vsel %vm208_vm8, %v197_v9, 0.0 }
 0x182   :  { %v199_v10 = vpop.permute.xlu1 %198  ;;  %v203_v15 = vpop.permute.xlu2 %202 }
 0x183   :  { %v210_v11 = vsel %vm208_vm8, %v199_v10, 0.0  ;;  %v214_v21 = vsel %vm208_vm8, %v203_v15, 0.0 }
 0x184   :  { %v211_v14 = vadd.f32 %v210_v11, %v209_v12 }
 0x18a   :  { %v201_v16 = vpop.permute.xlu1 %200 }
 0x18b   :  { %v212_v13 = vsel %vm208_vm8, %v201_v16, 0.0 }
 0x18c   :  { %v213_v20 = vadd.f32 %v212_v13, %v211_v14 }
 0x18e   :  { %v215_v23 = vadd.f32 %v214_v21, %v213_v20 }
 0x190   :  { %216 = vadd.xlane.f32.xlu0 %v215_v23 }
 0x192   :  { %v236_v26 = vpop.permute.xlu1 %235 }
 0x193   :  { %v246_v27 = vsel %vm208_vm8, %v236_v26, 0.0 }
 0x194   :  { %v247_v28 = vadd.f32 %v246_v27, %v245_v25 }
 0x196   :  { %248 = vadd.xlane.f32.xlu2 %v247_v28 }
 0x203   :  { %v217_v29 = vpop.xlane.xlu0 %216 }
 0x204   :  { %v218_v30 = vrot.slane %v217_v29, 4 }
 0x206   :  { %v219_v31 = vadd.f32 %v218_v30, %v217_v29 }
 0x208   :  { %v220_v32 = vrot.slane %v219_v31, 2 }
 0x209   :  { %v249_v33 = vpop.xlane.xlu2 %248 }
 0x20a   :  { %v250_v34 = vrot.slane %v249_v33, 4  ;;  %v221_v35 = vadd.f32 %v220_v32, %v219_v31 }
 0x20c   :  { %v251_v36 = vadd.f32 %v250_v34, %v249_v33  ;;  %v222_v37 = vrot.slane %v221_v35, 1 }
 0x20e   :  { %v252_v38 = vrot.slane %v251_v36, 2  ;;  %v223_v39 = vadd.f32 %v222_v37, %v221_v35 }
 0x210   :  { %v253_v40 = vadd.f32 %v252_v38, %v251_v36  ;;  %292 = vpush %v223_v39 }
 0x212   :  { %v254_v41 = vrot.slane %v253_v40, 1 }
 0x214   :  { %v255_v42 = vadd.f32 %v254_v41, %v253_v40 }
 0x216   :  { %294 = vpush %v255_v42 }
 0x241   :  { %s293_s2 = spop %292 }
 0x242   :  { %v271_v46 = vstv %s293_s2 }
 0x247   :  { %s295_s7 = spop %294 }
 0x248   :  { %v269_v45 = vstv %s295_s7 }
 0x249   :  { %v270_v47 = vsel %vm267_vm9, %v269_v45, 0.0 }
 0x24a   :  { %v272_v48 = vsel %vm265_vm10, %v271_v46, %v270_v47 }
 0x24b   :  { %273 = vst [vmem:[%s427_s4] sm:$0xff] %v272_v48 }

</bundles_post_ra>
